<compile_context>
chip_gen: v7x
topology: tpu7x:2x2x1
jax: 0.10.0
libtpu: 0.0.40
codegen_flags: <defaults>
</compile_context>

<pallas_src>
import math

import jax
import jax.numpy as jnp
from jax.experimental import pallas as pl
from jax.experimental.pallas import tpu as pltpu

_LANE = 128
_DEFAULT_BLOCK_BYTES = 3 << 19          # 1.5 MiB: near the HBM-roofline knee
_PREFER_XLA_BELOW_BYTES = 4 << 20       # below this, let XLA fuse the add


def _pos_embed_kernel(x_ref, pe_ref, o_ref):
    # x_ref/o_ref: (tB, 1, tL); pe_ref: (1, tL).  Add at the promoted dtype
    # (o_ref.dtype) and broadcast over the batch tile in-kernel.
    x = x_ref[...].astype(o_ref.dtype)
    pe = pe_ref[...].astype(o_ref.dtype)
    o_ref[...] = x + pe[None, ...]


def _vmem_budget():
    """(scoped_vmem_limit, per_block_cap) in bytes, generation aware.

    Live pipeline buffers ~= 5 blocks (2x x, 2x out, 1x single-buffered
    pos_embed).  Request a 32 MiB scoped limit (safe on every generation:
    physical VMEM is 64 MiB on v7x, 128 MiB on v5e/v6e) and keep live buffers
    under ~60% of it, leaving headroom for Mosaic scratch.
    """
    try:
        phys = pltpu.get_tpu_info().vmem_capacity_bytes
    except Exception:
        phys = 64 << 20                  # assume the tightest generation (v7x)
    scoped = min(32 << 20, phys // 2)
    per_block = max(1 << 19, (scoped * 6 // 10) // 5)
    return scoped, per_block


def _choose_tiles(B, L, itemsize, block_bytes):
    """Pick (tB, tL): tL is a lane-dense (multiple-of-128) chunk of the
    flattened feature axis; tB packs batch rows into the block up to the byte
    budget so small per-row tiles don't pay per-step pipeline overhead."""
    max_tl = max(_LANE, (block_bytes // itemsize) // _LANE * _LANE)
    tl = L if L <= max_tl else max_tl
    tb = max(1, min(B, block_bytes // max(1, tl * itemsize)))
    return tb, tl


def pos_embed_forward(x, pos_embed, *, block_bytes=None, force_kernel=False,
                      prefer_xla_below_bytes=_PREFER_XLA_BELOW_BYTES):
    """PosEmbed.forward: x + pos_embed[None].  x: [B, *feat], pos_embed: [*feat]."""
    assert x.ndim >= 2, "x must have a leading batch dimension"
    feat_shape = x.shape[1:]
    assert pos_embed.shape == feat_shape, (
        f"pos_embed shape {pos_embed.shape} != x feature shape {feat_shape}")

    B = x.shape[0]
    L = int(math.prod(feat_shape))
    # PyTorch's mixed-dtype broadcast add promotes (bf16 + f32 -> f32).
    out_dtype = jnp.promote_types(x.dtype, pos_embed.dtype)
    out_bytes = B * L * jnp.dtype(out_dtype).itemsize

    # A standalone pallas_call cannot beat a fused XLA elementwise add for
    # tiny or lane-sparse shapes; dispatch there unless explicitly forced.
    if not force_kernel and (out_bytes < prefer_xla_below_bytes or L < _LANE):
        return (x.astype(out_dtype)
                + pos_embed.astype(out_dtype)[None]).reshape(x.shape)

    itemsize = max(jnp.dtype(x.dtype).itemsize,
                   jnp.dtype(pos_embed.dtype).itemsize,
                   jnp.dtype(out_dtype).itemsize)
    scoped_vmem, block_cap = _vmem_budget()
    blk = _DEFAULT_BLOCK_BYTES if block_bytes is None else int(block_bytes)
    blk = max(_LANE * itemsize, min(blk, block_cap))
    tb, tl = _choose_tiles(B, L, itemsize, blk)

    n_l = pl.cdiv(L, tl)
    n_b = pl.cdiv(B, tb)

    x3 = x.reshape(B, 1, L)               # free row-major reshapes
    pe2 = pos_embed.reshape(1, L)

    cost = pl.CostEstimate(
        flops=B * L,
        transcendentals=0,
        bytes_accessed=int(x.size * jnp.dtype(x.dtype).itemsize
                           + pos_embed.size * jnp.dtype(pos_embed.dtype).itemsize
                           + out_bytes))

    def _run(pe_spec):
        return pl.pallas_call(
            _pos_embed_kernel,
            out_shape=jax.ShapeDtypeStruct((B, 1, L), out_dtype),
            grid_spec=pltpu.PrefetchScalarGridSpec(
                num_scalar_prefetch=0,
                # Batch innermost: pos_embed's block index is constant along
                # it, so each pos_embed tile is fetched from HBM once per
                # L-tile and reused for every batch tile.
                grid=(n_l, n_b),
                in_specs=[
                    pl.BlockSpec((tb, 1, tl), lambda l, b: (b, 0, l)),
                    pe_spec,
                ],
                out_specs=pl.BlockSpec((tb, 1, tl), lambda l, b: (b, 0, l)),
            ),
            compiler_params=pltpu.CompilerParams(
                dimension_semantics=("parallel", "parallel"),
                vmem_limit_bytes=scoped_vmem,
            ),
            cost_estimate=cost,
        )(x3, pe2)

    try:
        # Single-buffer the reused pos_embed tile.
        out3 = _run(pl.BlockSpec((1, tl), lambda l, b: (0, l),
                                 pipeline_mode=pl.Buffered(1)))
    except Exception:
        # Fallback for runtimes that reject pipeline_mode overrides.
        out3 = _run(pl.BlockSpec((1, tl), lambda l, b: (0, l)))

    return out3.reshape(x.shape)


def init_pos_embed(key, input_size, std=0.02):
    # Matches torch.nn.init.trunc_normal_(mean=0, std=0.02, a=-2, b=2).
    lo, hi = -2.0 / std, 2.0 / std
    return std * jax.random.truncated_normal(key, lo, hi, input_size,
                                             jnp.float32)


if __name__ == "__main__":
    key = jax.random.PRNGKey(0)
    k_x, k_pe, k_x2, k_pe2 = jax.random.split(key, 4)

    # Small shapes consistent with the module: x [B, S, H], pos_embed [S, H].
    B, S, H = 4, 16, 256
    x = jax.random.normal(k_x, (B, S, H), dtype=jnp.float32)
    pos_embed = init_pos_embed(k_pe, (S, H))

    # Force small blocks so the real multi-step pipeline (pos_embed reuse
    # across the batch axis, batch tiling, single-buffered pe) is exercised
    # even at toy sizes -> grid (2 L-tiles, 4 batch steps).
    out = pos_embed_forward(x, pos_embed, block_bytes=8 * 1024,
                            force_kernel=True)
    out = jax.block_until_ready(out)
    ref = x + pos_embed[None, :, :]
    assert out.shape == ref.shape and out.dtype == ref.dtype
    assert jnp.allclose(out, ref, atol=1e-6, rtol=1e-6), "mismatch vs reference"

    # Mixed-dtype check: bf16 activations + f32 pos_embed promote to f32,
    # matching PyTorch's broadcast-add type promotion.
    xb = jax.random.normal(k_x2, (2, 8, 128), dtype=jnp.bfloat16)
    peb = init_pos_embed(k_pe2, (8, 128))
    outb = jax.block_until_ready(pos_embed_forward(xb, peb, force_kernel=True))
    refb = xb.astype(jnp.float32) + peb[None, :, :]
    assert outb.dtype == jnp.float32
    assert jnp.allclose(outb, refb, atol=1e-6, rtol=1e-6), "mixed-dtype mismatch"

    print("KERNEL_OK")
</pallas_src>

<mosaic_0001>
module attributes {stable_mosaic.version = 11 : i64} {
  func.func @_pos_embed_kernel(%arg0: i32, %arg1: i32, %arg2: memref<1x1x2048xf32, #tpu.memory_space<vmem>>, %arg3: memref<1x2048xf32, #tpu.memory_space<vmem>>, %arg4: memref<1x1x2048xf32, #tpu.memory_space<vmem>>) attributes {dimension_semantics = [#tpu.dimension_semantics<parallel>, #tpu.dimension_semantics<parallel>], iteration_bounds = array<i64: 2, 4>, scalar_prefetch = 0 : i64, scratch_operands = 0 : i64, tpu.core_type = #tpu.core_type<tc>, window_params = [{transform_indices = @transform_0, window_bounds = array<i64: 1, 1, 2048>}, {pipeline_mode = #tpu.pipeline_mode<synchronous>, transform_indices = @transform_1, window_bounds = array<i64: 1, 2048>}, {transform_indices = @transform_2, window_bounds = array<i64: 1, 1, 2048>}]} {
    %c0 = arith.constant 0 : index
    %c0_0 = arith.constant 0 : index
    %c0_1 = arith.constant 0 : index
    %0 = vector.load %arg2[%c0, %c0_0, %c0_1] : memref<1x1x2048xf32, #tpu.memory_space<vmem>>, vector<1x1x2048xf32>
    %c0_2 = arith.constant 0 : index
    %c0_3 = arith.constant 0 : index
    %1 = vector.load %arg3[%c0_2, %c0_3] : memref<1x2048xf32, #tpu.memory_space<vmem>>, vector<1x2048xf32>
    %2 = vector.shape_cast %1 : vector<1x2048xf32> to vector<1x1x2048xf32>
    %3 = arith.addf %0, %2 : vector<1x1x2048xf32>
    %c0_4 = arith.constant 0 : index
    %c0_5 = arith.constant 0 : index
    %c0_6 = arith.constant 0 : index
    %4 = vector.load %arg4[%c0_4, %c0_5, %c0_6] : memref<1x1x2048xf32, #tpu.memory_space<vmem>>, vector<1x1x2048xf32>
    tpu.vector_store %arg4[%c0_4, %c0_5, %c0_6], %3 {strides = array<i32>} : memref<1x1x2048xf32, #tpu.memory_space<vmem>>, vector<1x1x2048xf32>,
    return
  }
  func.func @transform_0(%arg0: i32, %arg1: i32) -> (i32, i32, i32) {
    %c0_i32 = arith.constant 0 : i32
    %c0_i32_0 = arith.constant 0 : i32
    return %arg1, %c0_i32, %arg0 : i32, i32, i32
  }
  func.func @transform_1(%arg0: i32, %arg1: i32) -> (i32, i32) {
    %c0_i32 = arith.constant 0 : i32
    %c0_i32_0 = arith.constant 0 : i32
    return %c0_i32, %arg0 : i32, i32
  }
  func.func @transform_2(%arg0: i32, %arg1: i32) -> (i32, i32, i32) {
    %c0_i32 = arith.constant 0 : i32
    %c0_i32_0 = arith.constant 0 : i32
    return %arg1, %c0_i32, %arg0 : i32, i32, i32
  }
}

module attributes {stable_mosaic.version = 11 : i64} {
  func.func @_pos_embed_kernel(%arg0: i32, %arg1: i32, %arg2: memref<1x1x2048xf32, #tpu.memory_space<vmem>>, %arg3: memref<1x2048xf32, #tpu.memory_space<vmem>>, %arg4: memref<1x1x2048xf32, #tpu.memory_space<vmem>>) attributes {dimension_semantics = [#tpu.dimension_semantics<parallel>, #tpu.dimension_semantics<parallel>], iteration_bounds = array<i64: 2, 4>, scalar_prefetch = 0 : i64, scratch_operands = 0 : i64, tpu.core_type = #tpu.core_type<tc>, window_params = [{transform_indices = @transform_0, window_bounds = array<i64: 1, 1, 2048>}, {transform_indices = @transform_1, window_bounds = array<i64: 1, 2048>}, {transform_indices = @transform_2, window_bounds = array<i64: 1, 1, 2048>}]} {
    %c0 = arith.constant 0 : index
    %c0_0 = arith.constant 0 : index
    %c0_1 = arith.constant 0 : index
    %0 = vector.load %arg2[%c0, %c0_0, %c0_1] : memref<1x1x2048xf32, #tpu.memory_space<vmem>>, vector<1x1x2048xf32>
    %c0_2 = arith.constant 0 : index
    %c0_3 = arith.constant 0 : index
    %1 = vector.load %arg3[%c0_2, %c0_3] : memref<1x2048xf32, #tpu.memory_space<vmem>>, vector<1x2048xf32>
    %2 = vector.shape_cast %1 : vector<1x2048xf32> to vector<1x1x2048xf32>
    %3 = arith.addf %0, %2 : vector<1x1x2048xf32>
    %c0_4 = arith.constant 0 : index
    %c0_5 = arith.constant 0 : index
    %c0_6 = arith.constant 0 : index
    %4 = vector.load %arg4[%c0_4, %c0_5, %c0_6] : memref<1x1x2048xf32, #tpu.memory_space<vmem>>, vector<1x1x2048xf32>
    tpu.vector_store %arg4[%c0_4, %c0_5, %c0_6], %3 {strides = array<i32>} : memref<1x1x2048xf32, #tpu.memory_space<vmem>>, vector<1x1x2048xf32>,
    return
  }
  func.func @transform_0(%arg0: i32, %arg1: i32) -> (i32, i32, i32) {
    %c0_i32 = arith.constant 0 : i32
    %c0_i32_0 = arith.constant 0 : i32
    return %arg1, %c0_i32, %arg0 : i32, i32, i32
  }
  func.func @transform_1(%arg0: i32, %arg1: i32) -> (i32, i32) {
    %c0_i32 = arith.constant 0 : i32
    %c0_i32_0 = arith.constant 0 : i32
    return %c0_i32, %arg0 : i32, i32
  }
  func.func @transform_2(%arg0: i32, %arg1: i32) -> (i32, i32, i32) {
    %c0_i32 = arith.constant 0 : i32
    %c0_i32_0 = arith.constant 0 : i32
    return %arg1, %c0_i32, %arg0 : i32, i32, i32
  }
}

</mosaic_0001>

<bundles_post_ra>
// kernel: tpu_custom_call.1
= control target key start
LH: loop header
LB: loop body
LE: loop exit
PB: predicated region body
PF: predicated region fallthrough
CT: control target
= control target key end

     0   :  { %s928_s0 = inlined_call_operand.hbm [shape: f32[4,1,4096], index: 0, kind: input, shape index: {}]   ;;  %s929_s1 = inlined_call_operand.hbm [shape: f32[1,4096], index: 1, kind: input, shape index: {}]   ;;  %s930_s2 = inlined_call_operand.hbm [shape: f32[4,1,4096], index: 2, kind: output, shape index: {}]  }
   0x1   :  { %942 = sst [smem:[#allocation17_spill]] %s929_s1 }
   0x2   :  { %943 = sst [smem:[#allocation18_spill]] %s930_s2 }
   0x3   :  { %7 = vsyncpa [#allocation3], 0 }
   0x4   :  { %9 = vsyncpa [#allocation3 + $0x1], 0 }
   0x5   :  { %10 = vsyncpa [#allocation6], 0 }
   0x6   :  { %11 = vsyncpa [#allocation4], 0 }
   0x7   :  { %13 = vsyncpa [#allocation4 + $0x1], 0  ;;  %s661_s9 = smov 0   ;;  %s663_s10 = smov 0  }
   0x8   :  { %s665_s11 = smov 0   ;;  %s667_s12 = smov 0  }
   0x9   :  { %s669_s13 = smov 0   ;;  %s671_s14 = smov 0  }
   0xa   :  { %s673_s15 = smov 0   ;;  %s675_s16 = smov 0  }
   0xb   :  { %s677_s17 = smov 0   ;;  %s679_s18 = smov 0  }
   0xc   :  { %s681_s19 = smov 0  }
   0xd LB: > { %944 = sst [smem:[#allocation11_spill]] %s605_s10  ;;  %s326_s20 = sadd.s32 4294967295, %s641_s19   ;;  %s641_s19 = sphi %s681_s19, %s19_s19   ;;  %s637_s18 = sphi %s679_s18, %s980_s18   ;;  %s633_s17 = sphi %s677_s17, %s979_s17   ;;  %s629_s16 = sphi %s675_s16, %s978_s16   ;;  %s625_s15 = sphi %s673_s15, %s977_s15   ;;  %s621_s14 = sphi %s671_s14, %s976_s14   ;;  %s617_s13 = sphi %s669_s13, %s975_s13   ;;  %s613_s12 = sphi %s667_s12, %s974_s12   ;;  %s609_s11 = sphi %s665_s11, %s973_s11   ;;  %s605_s10 = sphi %s663_s10, %s972_s10   ;;  %s601_s9 = sphi %s661_s9, %s970_s9  }
   0xe   : > { %945 = sst [smem:[#allocation12_spill]] %s613_s12  ;;  %s327_s21 = sadd.s32 4294967294, %s641_s19  }
   0xf   : > { %946 = sst [smem:[#allocation13_spill]] %s625_s15  ;;  %p53_p0 = scmp.ne.s32.totalorder %s617_s13, %s613_s12 }
  0x10   : > { %p54_p1 = scmp.eq.s32.totalorder %s326_s20, 0  ;;  %p79_p2 = scmp.ne.s32.totalorder %s605_s10, %s601_s9 }
  0x11   : > { %p719_p3 = scmp.eq.s32.totalorder %s326_s20, 7  ;;  %p111_p5 = scmp.eq.s32.totalorder %s327_s21, 7 }
  0x12   : > { %p723_p4 = por %p54_p1, %p53_p0  ;;  %p727_p6 = por %p79_p2, %p54_p1 }
  0x13   : > { %s947_s22 = scalar_select %p719_p3, 1, 0 }
  0x14   : > { %s948_s23 = scalar_select %p723_p4, 1, 0 }
  0x15   : > { %s949_s24 = scalar_select %p727_p6, 1, 0 }
  0x16   : > { %p328_p7 = scmp.ge.s32.totalorder %s641_s19, 1  ;;  %p732_p8 = por %p111_p5, %p53_p0 }
  0x17   : > { %p118_p9 = scmp.lt.s32.totalorder %s641_s19, 9  ;;  %s345_s26 = sshll.u32 %s629_s16, 8 }
  0x18   : > { %s950_s25 = scalar_select %p732_p8, 1, 0 }
  0x19   : > { %p738_p10 = pnand %p328_p7, %p118_p9  ;;  %s953_s1 = sld [smem:[#allocation17_spill]] }
  0x1a   : > { %951 = sst [smem:[#allocation14_spill]] %s950_s25  ;;  %s643_s3 = smov [#allocation5]  }
  0x1b   : > { %s952_s27 = scalar_select %p738_p10, 1, 0 }
  0x1c   : > { %s134_s4 = sshll.u32 %s643_s3, 4  ;;  %p352_p11 = pneg %p738_p10  ;;  %s135_s4 = int_to_ptr.vmem [resolvable:$true] %s134_s4 }
  0x1e   : > { %p749_p12 = pnand %p352_p11, %p727_p6 }
  0x1f   : > { %s132_s30 = scalar_lea.hbm %s953_s1, %s345_s26  ;;  %s460_s9 = scalar_lea.hbm %s953_s1, 512 }
  0x20   : > { %s455_s6 = scalar_lea.hbm %s132_s30, 256  ;;  %p457_p0 = pneg %p749_p12 }
  0x21   : > { %p456_p13 = scmp.ne.s32.totalorder %s132_s30, %s455_s6  ;;  %p461_p5 = scmp.lt.u32.totalorder %s132_s30, %s953_s1 }
  0x22   : > { %p462_p7 = scmp.lt.u32.totalorder %s460_s9, %s455_s6  ;;  %p464_p11 = scmp.lt.u32.totalorder %s455_s6, %s132_s30 }
  0x23   : > { %p458_p1 = pnand %p457_p0, %p456_p13 }
  0x24   : > { %p463_p9 = por %p462_p7, %p461_p5 }
  0x25   : > { %p459_p2 = pneg %p458_p1 }
  0x26   : > { %p465_p8 = por %p464_p11, %p463_p9 }
  0x28   : > { %p466_p6 = pnand %p465_p8, %p459_p2 }
  0x2a   : > { %469 = shalt.err (!%p466_p6)
}
  0x2b   : > { %s470_s26 = scalar_lea.vmem %s135_s4, 256  ;;  %p478_p10 = scmp.lt.s32.totalorder %s135_s4, %s135_s4 }
  0x2c   : > { %p471_p4 = scmp.ne.s32.totalorder %s135_s4, %s470_s26  ;;  %p479_p3 = scmp.lt.s32.totalorder %s470_s26, %s470_s26 }
  0x2e   : > { %p473_p13 = pnand %p471_p4, %p457_p0  ;;  %p480_p5 = por %p479_p3, %p478_p10 }
  0x30   : > { %p474_p1 = pneg %p473_p13 }
  0x32   : > { %p481_p7 = pnand %p480_p5, %p474_p1 }
  0x34   : > { %484 = shalt.err (!%p481_p7)
}
  0x35   : > { %355 = dma.hbm_to_vmem [thread:$0]  (!%p749_p12), %s132_s30, 256, %s135_s4, [#allocation6]  }
  0x36   : > { %s28_s28 = sadd.s32 1, %s633_s17  ;;  %s31_s29 = sadd.s32 1, %s637_s18 }
  0x37   : > { %p29_p3 = scmp.ge.s32.totalorder %s28_s28, 4  ;;  %s40_s3 = sadd.s32 1, %s621_s14 }
  0x38   : > { %p47_p4 = scmp.ne.s32.totalorder %s621_s14, %s617_s13  ;;  %p48_p6 = scmp.eq.s32.totalorder %s641_s19, 0 }
  0x39   : > { %s982_s28 = smov (%p29_p3, %s28_s28), 0  ;;  %s984_s29 = smov (!%p29_p3, %s31_s29), %s637_s18 }
  0x3a   : > { %955 = sst [smem:[#allocation15_spill]] %s982_s28  ;;  %s35_s5 = ssub.s32 %s633_s17, %s982_s28 }
  0x3b   : > { %p780_p8 = por %p48_p6, %p47_p4  ;;  %p33_p10 = scmp.ge.s32.totalorder %s984_s29, 2 }
  0x3c   : > { %s66_s30 = sadd.s32 1, %s609_s11  ;;  %p957_p12 = scmp.ne.s32.totalorder %s947_s22, 0 }
  0x3d   : > { %p364_p2 = scmp.lt.s32.totalorder %s641_s19, 8  ;;  %s986_s29 = smov (%p33_p10, %s984_s29), 0 }
  0x3e   : > { %p787_p0 = por %p957_p12, %p47_p4  ;;  %s145_s7 = sand.u32 1, %s621_s14  }
  0x3f   : > { %s333_s8 = sshll.u32 %s637_s18, 4  ;;  %s36_s9 = ssub.s32 %s637_s18, %s986_s29 }
  0x40   : > { %s958_s4 = scalar_select %p787_p0, 1, 0 }
  0x41   : > { %s37_s20 = sor.u32 %s36_s9, %s35_s5  ;;  %p64_p9 = scmp.eq.s32.totalorder %s36_s9, 0 }
  0x42   : > { %959 = sst [smem:[#allocation16_spill]] %s958_s4  ;;  %p38_p11 = scmp.eq.s32.totalorder %s37_s20, 0 }
  0x43   : > { %s332_s21 = sshll.u32 %s145_s7, 4  ;;  %s334_s1 = sshll.u32 %s633_s17, 5 }
  0x44   : > { %s799_s26 = scalar_select %p64_p9, %s609_s11, %s66_s30  }
  0x45   : > { %s802_s22 = scalar_select %p38_p11, %s621_s14, %s40_s3  }
  0x46   : > { %s155_s28 = sadd.s32 %s334_s1, %s333_s8  ;;  %s149_s10 = scalar_lea.vmem [#allocation2], %s332_s21 }
  0x47   : > { %s159_s25 = sshll.u32 %s149_s10, 4  ;;  %s335_s12 = sshll.u32 %s155_s28, 4  ;;  %s805_s25 = int_to_ptr.vmem [resolvable:$true] %s159_s25 }
  0x48   : > { %s810_s15 = scalar_lea.hbm %s928_s0, %s335_s12  ;;  %p816_p13 = pnand %p364_p2, %p780_p8 }
  0x49   : > { %s146_s1 = scalar_lea.sflag [#allocation3], %s145_s7  ;;  %s485_s10 = scalar_lea.hbm %s810_s15, 256 }
  0x4a   : > { %p486_p1 = scmp.ne.s32.totalorder %s810_s15, %s485_s10  ;;  %p487_p5 = pneg %p816_p13 }
  0x4b   : > { %s490_s28 = scalar_lea.hbm %s928_s0, 2048  ;;  %p491_p4 = scmp.lt.u32.totalorder %s810_s15, %s928_s0 }
  0x4c   : > { %p488_p7 = pnand %p487_p5, %p486_p1  ;;  %p492_p6 = scmp.lt.u32.totalorder %s490_s28, %s485_s10 }
  0x4d   : > { %p494_p10 = scmp.lt.u32.totalorder %s485_s10, %s810_s15 }
  0x4e   : > { %p489_p3 = pneg %p488_p7  ;;  %p493_p8 = por %p492_p6, %p491_p4 }
  0x50   : > { %p495_p12 = por %p494_p10, %p493_p8 }
  0x52   : > { %p496_p2 = pnand %p495_p12, %p489_p3 }
  0x54   : > { %499 = shalt.err (!%p496_p2)
}
  0x55   : > { %s500_s30 = scalar_lea.vmem %s805_s25, 256  ;;  %s644_s4 = smov [#allocation2]  }
  0x56   : > { %p501_p9 = scmp.ne.s32.totalorder %s805_s25, %s500_s30  ;;  %s505_s7 = sshll.u32 %s644_s4, 4  ;;  %s506_s7 = int_to_ptr.vmem [resolvable:$false] %s505_s7 }
  0x57   : > { %s507_s8 = scalar_lea.vmem %s506_s7, 512  ;;  %p508_p7 = scmp.lt.s32.totalorder %s805_s25, %s506_s7 }
  0x58   : > { %p503_p11 = pnand %p501_p9, %p487_p5  ;;  %p509_p4 = scmp.lt.s32.totalorder %s507_s8, %s500_s30 }
  0x5a   : > { %p504_p1 = pneg %p503_p11  ;;  %p510_p6 = por %p509_p4, %p508_p7 }
  0x5c   : > { %p511_p8 = pnand %p510_p6, %p504_p1 }
  0x5e   : > { %514 = shalt.err (!%p511_p8)
}
  0x5f   : > { %359 = dma.hbm_to_vmem [thread:$0]  (!%p816_p13), %s810_s15, 256, %s805_s25, %s146_s1  }
  0x60   : > { %p961_p3 = scmp.ne.s32.totalorder %s952_s27, 0 }
  0x61   : > { %s848_s9 = sand.u32 (!%p961_p3), 1, %s617_s13   ;;  %p962_p5 = scmp.ne.s32.totalorder (!%p961_p3), %s948_s23, 0 }
  0x62   : > { %168 = sbr.rel (%p961_p3) target bundleno = 135 (0x87), region = 28  ;;  %s337_s20 = sshll.u32 (!%p961_p3), %s848_s9, 4 }
  0x63   : > { %s171_s21 = scalar_lea.sflag (!%p961_p3), [#allocation3], %s848_s9  ;;  %s174_s10 = scalar_lea.vmem (!%p961_p3), [#allocation2], %s337_s20 }
  0x69   : > { %588 = dma.done.wait (%p962_p5), %s171_s21, 256  }
  0x6a   : > { %590 = vsyncadd (%p962_p5), %s171_s21, 4294967040  ;;  %p963_p10 = scmp.ne.s32.totalorder %s949_s24, 0 }
  0x6c   : > { %592 = dma.done.wait (%p963_p10), [#allocation6], 256  }
  0x6d   : > { %594 = vsyncadd (%p963_p10), [#allocation6], 4294967040  ;;  %s964_s15 = sld [smem:[#allocation13_spill]]  ;;  %s340_s25 = sshll.u32 %s629_s16, 4  ;;  %v202_v0 = vld [vmem:[%s174_s10] sm:$0xff]  ;;  %v203_v2 = vld [vmem:[%s174_s10 + $0x8] sm:$0xff] }
  0x6e   : > { %s198_s1 = scalar_lea.vmem [#allocation7], %s337_s20  ;;  %v204_v1 = vld [vmem:[#allocation5] sm:$0xff]  ;;  %v205_v4 = vld [vmem:[#allocation5 + $0x8] sm:$0xff]  ;;  %s966_s24 = sld [smem:[#allocation18_spill]] }
  0x6f   : > { %s227_s12 = sshll.u32 %s198_s1, 4  ;;  %v206_v3 = vadd.f32 %v204_v1, %v202_v0  ;;  %v207_v5 = vadd.f32 %v205_v4, %v203_v2  ;;  %s211_s6 = scalar_lea.sflag [#allocation4], %s848_s9  ;;  %s862_s12 = int_to_ptr.vmem [resolvable:$true] %s227_s12 }
  0x70   : > { %s515_s30 = scalar_lea.vmem %s862_s12, 256  ;;  %s645_s4 = smov [#allocation7]  }
  0x71   : > { %208 = vst [vmem:[%s198_s1] sm:$0xff] %v206_v3  ;;  %209 = vst [vmem:[%s198_s1 + $0x8] sm:$0xff] %v207_v5  ;;  %p516_p13 = scmp.ne.s32.totalorder %s862_s12, %s515_s30  ;;  %s519_s7 = sshll.u32 %s645_s4, 4  ;;  %s520_s7 = int_to_ptr.vmem [resolvable:$false] %s519_s7 }
  0x72   : > { %s521_s8 = scalar_lea.vmem %s520_s7, 512  ;;  %p522_p9 = scmp.lt.s32.totalorder %s862_s12, %s520_s7 }
  0x73   : > { %s341_s27 = sshll.u32 %s964_s15, 5  ;;  %p517_p12 = pnand %p516_p13, %p787_p0 }
  0x74   : > { %s223_s3 = sadd.s32 %s341_s27, %s340_s25  ;;  %p523_p11 = scmp.lt.s32.totalorder %s521_s8, %s515_s30 }
  0x75   : > { %s342_s28 = sshll.u32 %s223_s3, 4  ;;  %p518_p2 = pneg %p517_p12 }
  0x76   : > { %s867_s5 = scalar_lea.hbm %s966_s24, %s342_s28  ;;  %p524_p1 = por %p523_p11, %p522_p9 }
  0x78   : > { %p525_p7 = pnand %p524_p1, %p518_p2 }
  0x7a   : > { %528 = shalt.err (!%p525_p7)
}
  0x7b   : > { %s529_s9 = scalar_lea.hbm %s867_s5, 256  ;;  %s533_s10 = scalar_lea.hbm %s966_s24, 2048 }
  0x7c   : > { %p530_p4 = scmp.ne.s32.totalorder %s867_s5, %s529_s9  ;;  %p534_p3 = scmp.lt.u32.totalorder %s867_s5, %s966_s24 }
  0x7d   : > { %p535_p5 = scmp.lt.u32.totalorder %s533_s10, %s529_s9  ;;  %p537_p13 = scmp.lt.u32.totalorder %s529_s9, %s867_s5 }
  0x7e   : > { %p531_p6 = pnand %p530_p4, %p787_p0 }
  0x7f   : > { %p536_p10 = por %p535_p5, %p534_p3 }
  0x80   : > { %p532_p8 = pneg %p531_p6 }
  0x81   : > { %p538_p12 = por %p537_p13, %p536_p10 }
  0x83   : > { %p539_p2 = pnand %p538_p12, %p532_p8 }
  0x85   : > { %542 = shalt.err (!%p539_p2)
}
  0x86   : > { %350 = dma.vmem_to_hbm [thread:$0]  (%p787_p0), %s862_s12, 256, %s867_s5, %s211_s6  }
  0x87 PF: > { %s967_s27 = sld [smem:[#allocation12_spill]]  ;;  %s968_s3 = sld [smem:[#allocation14_spill]] }
  0x88   : > { %p365_p9 = scmp.ge.s32.totalorder %s641_s19, 2 }
  0x8d   : > { %s239_s1 = sand.u32 1, %s967_s27   ;;  %p969_p11 = scmp.ne.s32.totalorder %s968_s3, 0 }
  0x8e   : > { %s240_s28 = scalar_lea.sflag [#allocation4], %s239_s1 }
  0x8f   : > { %p361_p1 = pnand %p365_p9, %p969_p11 }
  0x91   : > { %596 = dma.done.wait (!%p361_p1), %s240_s28, 256  }
  0x92   : > { %598 = vsyncadd (!%p361_p1), %s240_s28, 4294967040  ;;  %s19_s19 = sadd.s32 1, %s641_s19   ;;  %s970_s9 = sld [smem:[#allocation11_spill]] }
  0x93   : > { %p16_p7 = scmp.ge.s32.totalorder %s19_s19, 10   ;;  %s971_s2 = sld [smem:[#allocation15_spill]] }
  0x94   : > { %s972_s10 = smov %s609_s11  ;;  %s973_s11 = smov %s799_s26 }
  0x95   : > { %s974_s12 = smov %s617_s13  ;;  %s975_s13 = smov %s621_s14 }
  0x96   : > { %s976_s14 = smov %s802_s22  ;;  %s977_s15 = smov %s633_s17 }
  0x97   : > { %s978_s16 = smov %s637_s18  ;;  %s980_s18 = smov %s986_s29 }
  0x98   :  { %18 = sbr.rel (!%p16_p7) target bundleno = 13 (0xd), region = 78 }
  0x99   : > { %s979_s17 = smov %s971_s2 }
  0x9f   :  { %245 = vsyncpa [#allocation3], 1 }
  0xa0   :  { %247 = vsyncpa [#allocation3 + $0x1], 1 }
  0xa1   :  { %248 = vsyncpa [#allocation6], 1 }
  0xa2   :  { %249 = vsyncpa [#allocation4], 1 }
  0xa3   :  { %251 = vsyncpa [#allocation4 + $0x1], 1 }

// kernel: tpu_custom_call.1
= control target key start
LH: loop header
LB: loop body
LE: loop exit
PB: predicated region body
PF: predicated region fallthrough
CT: control target
= control target key end

     0   :  { %s990_s0 = inlined_call_operand.hbm [shape: f32[4,1,4096], index: 0, kind: input, shape index: {}]   ;;  %s991_s1 = inlined_call_operand.hbm [shape: f32[1,4096], index: 1, kind: input, shape index: {}]   ;;  %s992_s2 = inlined_call_operand.hbm [shape: f32[4,1,4096], index: 2, kind: output, shape index: {}]  }
   0x1   :  { %1002 = sst [smem:[#allocation14_spill]] %s992_s2 }
   0x2   :  { %7 = vsyncpa [#allocation3], 0 }
   0x3   :  { %9 = vsyncpa [#allocation3 + $0x1], 0 }
   0x4   :  { %10 = vsyncpa [#allocation6], 0 }
   0x5   :  { %12 = vsyncpa [#allocation6 + $0x1], 0 }
   0x6   :  { %13 = vsyncpa [#allocation4], 0 }
   0x7   :  { %15 = vsyncpa [#allocation4 + $0x1], 0  ;;  %s689_s9 = smov 0   ;;  %s691_s10 = smov 0  }
   0x8   :  { %s693_s11 = smov 0   ;;  %s695_s12 = smov 0  }
   0x9   :  { %s697_s13 = smov 0   ;;  %s699_s14 = smov 0  }
   0xa   :  { %s701_s15 = smov 0   ;;  %s703_s16 = smov 0  }
   0xb   :  { %s705_s17 = smov 0   ;;  %s707_s18 = smov 0  }
   0xc   :  { %s709_s19 = smov 0  }
   0xd LB: > { %1003 = sst [smem:[#allocation11_spill]] %s641_s12  ;;  %s354_s20 = sadd.s32 4294967295, %s669_s19   ;;  %s669_s19 = sphi %s709_s19, %s21_s19   ;;  %s665_s18 = sphi %s707_s18, %s1038_s18   ;;  %s661_s17 = sphi %s705_s17, %s1037_s17   ;;  %s657_s16 = sphi %s703_s16, %s1036_s16   ;;  %s653_s15 = sphi %s701_s15, %s1035_s15   ;;  %s649_s14 = sphi %s699_s14, %s1034_s14   ;;  %s645_s13 = sphi %s697_s13, %s1033_s13   ;;  %s641_s12 = sphi %s695_s12, %s1032_s12   ;;  %s637_s11 = sphi %s693_s11, %s1031_s11   ;;  %s633_s10 = sphi %s691_s10, %s1030_s10   ;;  %s629_s9 = sphi %s689_s9, %s1029_s9  }
   0xe   : > { %s355_s21 = sadd.s32 4294967294, %s669_s19   ;;  %s30_s22 = sadd.s32 1, %s661_s17 }
   0xf   : > { %s33_s23 = sadd.s32 1, %s665_s18  ;;  %p31_p0 = scmp.ge.s32.totalorder %s30_s22, 4 }
  0x10   : > { %s42_s24 = sadd.s32 1, %s649_s14  ;;  %p49_p1 = scmp.ne.s32.totalorder %s649_s14, %s645_s13 }
  0x11   : > { %p997_p2 = scmp.eq.s32.totalorder %s669_s19, 0  ;;  %s1040_s22 = smov (%p31_p0, %s30_s22), 0 }
  0x12   : > { %1004 = sst [smem:[#allocation12_spill]] %s1040_s22  ;;  %s1042_s23 = smov (!%p31_p0, %s33_s23), %s665_s18 }
  0x13   : > { %s37_s25 = ssub.s32 %s661_s17, %s1040_s22  ;;  %p759_p3 = por %p997_p2, %p49_p1 }
  0x14   : > { %p35_p4 = scmp.ge.s32.totalorder %s1042_s23, 2  ;;  %p55_p5 = scmp.ne.s32.totalorder %s645_s13, %s641_s12 }
  0x15   : > { %p765_p6 = scmp.eq.s32.totalorder %s354_s20, 0  ;;  %p107_p7 = scmp.eq.s32.totalorder %s354_s20, 7 }
  0x16   : > { %s1044_s23 = smov (%p35_p4, %s1042_s23), 0  ;;  %p113_p10 = scmp.eq.s32.totalorder %s355_s21, 7 }
  0x17   : > { %1007 = sst [smem:[#allocation13_spill]] %s1044_s23  ;;  %p773_p8 = por %p765_p6, %p55_p5 }
  0x18   : > { %p777_p9 = por %p107_p7, %p49_p1  ;;  %s783_s30 = ssub.s32 %s665_s18, %s1044_s23 }
  0x19   : > { %s1008_s28 = scalar_select %p773_p8, 1, 0 }
  0x1a   : > { %s1009_s29 = scalar_select %p777_p9, 1, 0 }
  0x1b   : > { %s39_s3 = sor.u32 %s783_s30, %s37_s25  ;;  %p787_p13 = por %p113_p10, %p55_p5 }
  0x1c   : > { %p40_p12 = scmp.eq.s32.totalorder %s39_s3, 0  ;;  %p998_p0 = scmp.lt.s32.totalorder %s669_s19, 8 }
  0x1d   : > { %s1010_s4 = scalar_select %p787_p13, 1, 0 }
  0x1e   : > { %s793_s5 = scalar_select %p40_p12, %s649_s14, %s42_s24  }
  0x1f   : > { %s133_s6 = sand.u32 1, %s649_s14   ;;  %s359_s7 = sshll.u32 %s665_s18, 4 }
  0x20   : > { %s358_s8 = sshll.u32 %s133_s6, 4  ;;  %s360_s20 = sshll.u32 %s661_s17, 5 }
  0x21   : > { %s143_s23 = sadd.s32 %s360_s20, %s359_s7  ;;  %s137_s21 = scalar_lea.vmem [#allocation2], %s358_s8 }
  0x22   : > { %s147_s25 = sshll.u32 %s137_s21, 4  ;;  %s361_s22 = sshll.u32 %s143_s23, 4  ;;  %s798_s25 = int_to_ptr.vmem [resolvable:$true] %s147_s25 }
  0x23   : > { %s803_s2 = scalar_lea.hbm %s990_s0, %s361_s22  ;;  %p809_p1 = pnand %p998_p0, %p759_p3 }
  0x24   : > { %s134_s23 = scalar_lea.sflag [#allocation3], %s133_s6  ;;  %s483_s7 = scalar_lea.hbm %s803_s2, 256 }
  0x25   : > { %p484_p7 = scmp.ne.s32.totalorder %s803_s2, %s483_s7  ;;  %p485_p10 = pneg %p809_p1 }
  0x26   : > { %s488_s26 = scalar_lea.hbm %s990_s0, 2048  ;;  %p489_p3 = scmp.lt.u32.totalorder %s803_s2, %s990_s0 }
  0x27   : > { %p486_p12 = pnand %p485_p10, %p484_p7  ;;  %p490_p0 = scmp.lt.u32.totalorder %s488_s26, %s483_s7 }
  0x28   : > { %p492_p4 = scmp.lt.u32.totalorder %s483_s7, %s803_s2 }
  0x29   : > { %p487_p2 = pneg %p486_p12  ;;  %p491_p11 = por %p490_p0, %p489_p3 }
  0x2b   : > { %p493_p5 = por %p492_p4, %p491_p11 }
  0x2d   : > { %p494_p13 = pnand %p493_p5, %p487_p2 }
  0x2f   : > { %497 = shalt.err (!%p494_p13)
}
  0x30   : > { %s498_s6 = scalar_lea.vmem %s798_s25, 256  ;;  %s671_s21 = smov [#allocation2]  }
  0x31   : > { %p499_p7 = scmp.ne.s32.totalorder %s798_s25, %s498_s6  ;;  %s503_s3 = sshll.u32 %s671_s21, 4  ;;  %s504_s3 = int_to_ptr.vmem [resolvable:$false] %s503_s3 }
  0x32   : > { %s505_s12 = scalar_lea.vmem %s504_s3, 512  ;;  %p506_p8 = scmp.lt.s32.totalorder %s798_s25, %s504_s3 }
  0x33   : > { %p501_p12 = pnand %p499_p7, %p485_p10  ;;  %p507_p0 = scmp.lt.s32.totalorder %s505_s12, %s498_s6 }
  0x35   : > { %p502_p9 = pneg %p501_p12  ;;  %p508_p3 = por %p507_p0, %p506_p8 }
  0x37   : > { %p509_p11 = pnand %p508_p3, %p502_p9 }
  0x39   : > { %512 = shalt.err (!%p509_p11)
}
  0x3a   : > { %385 = dma.hbm_to_vmem [thread:$0]  (!%p809_p1), %s803_s2, 256, %s798_s25, %s134_s23  }
  0x3b   : > { %p1012_p2 = scmp.lt.s32.totalorder %s669_s19, 9  ;;  %p1013_p8 = scmp.ge.s32.totalorder %s669_s19, 1 }
  0x3c   : > { %s68_s7 = sadd.s32 1, %s637_s11  ;;  %p75_p13 = scmp.ne.s32.totalorder %s637_s11, %s633_s10 }
  0x3d   : > { %p844_p9 = pnand %p1013_p8, %p1012_p2  ;;  %p1015_p4 = scmp.eq.s32.totalorder %s783_s30, 0 }
  0x3e   : > { %p1016_p5 = scmp.eq.s32.totalorder %s669_s19, 0  ;;  %p81_p7 = scmp.ne.s32.totalorder %s633_s10, %s629_s9 }
  0x3f   : > { %s854_s22 = scalar_select %p1015_p4, %s637_s11, %s68_s7  }
  0x40   : > { %p77_p10 = por %p75_p13, %p1016_p5  ;;  %s154_s26 = sand.u32 1, %s637_s11  }
  0x41   : > { %s375_s8 = sshll.u32 %s665_s18, 8  ;;  %p864_p12 = por %p81_p7, %p765_p6 }
  0x42   : > { %s362_s2 = sshll.u32 %s154_s26, 4  ;;  %s871_s6 = scalar_lea.hbm %s991_s1, %s375_s8 }
  0x43   : > { %s1017_s20 = scalar_select %p864_p12, 1, 0 }
  0x44   : > { %p1018_p1 = scmp.lt.s32.totalorder %s669_s19, 8  ;;  %s158_s27 = scalar_lea.vmem [#allocation5], %s362_s2 }
  0x45   : > { %s166_s30 = sshll.u32 %s158_s27, 4  ;;  %s155_s21 = scalar_lea.sflag [#allocation6], %s154_s26  ;;  %s879_s30 = int_to_ptr.vmem [resolvable:$true] %s166_s30 }
  0x46   : > { %p875_p0 = pnand %p1018_p1, %p77_p10  ;;  %s513_s3 = scalar_lea.hbm %s871_s6, 256 }
  0x47   : > { %p514_p6 = scmp.ne.s32.totalorder %s871_s6, %s513_s3  ;;  %s518_s8 = scalar_lea.hbm %s991_s1, 512 }
  0x48   : > { %p515_p3 = pneg %p875_p0  ;;  %p519_p8 = scmp.lt.u32.totalorder %s871_s6, %s991_s1 }
  0x49   : > { %p520_p13 = scmp.lt.u32.totalorder %s518_s8, %s513_s3  ;;  %p522_p5 = scmp.lt.u32.totalorder %s513_s3, %s871_s6 }
  0x4a   : > { %p516_p11 = pnand %p515_p3, %p514_p6 }
  0x4b   : > { %p521_p4 = por %p520_p13, %p519_p8 }
  0x4c   : > { %p517_p2 = pneg %p516_p11 }
  0x4d   : > { %p523_p10 = por %p522_p5, %p521_p4 }
  0x4f   : > { %p524_p7 = pnand %p523_p10, %p517_p2 }
  0x51   : > { %527 = shalt.err (!%p524_p7)
}
  0x52   : > { %s528_s26 = scalar_lea.vmem %s879_s30, 256  ;;  %s672_s2 = smov [#allocation5]  }
  0x53   : > { %p529_p1 = scmp.ne.s32.totalorder %s879_s30, %s528_s26  ;;  %s533_s27 = sshll.u32 %s672_s2, 4  ;;  %s534_s27 = int_to_ptr.vmem [resolvable:$false] %s533_s27 }
  0x54   : > { %s535_s12 = scalar_lea.vmem %s534_s27, 512  ;;  %p536_p12 = scmp.lt.s32.totalorder %s879_s30, %s534_s27 }
  0x55   : > { %p531_p6 = pnand %p529_p1, %p515_p3  ;;  %p537_p8 = scmp.lt.s32.totalorder %s535_s12, %s528_s26 }
  0x57   : > { %p532_p11 = pneg %p531_p6  ;;  %p538_p13 = por %p537_p8, %p536_p12 }
  0x59   : > { %p539_p4 = pnand %p538_p13, %p532_p11 }
  0x5b   : > { %542 = shalt.err (!%p539_p4)
}
  0x5c   : > { %388 = dma.hbm_to_vmem [thread:$0]  (!%p875_p0), %s871_s6, 256, %s879_s30, %s155_s21  }
  0x5d   : > { %175 = sbr.rel (%p844_p9) target bundleno = 132 (0x84), region = 28  ;;  %s909_s3 = sand.u32 (!%p844_p9), 1, %s645_s13  }
  0x5e   : > { %s366_s7 = sshll.u32 (!%p844_p9), %s909_s3, 4  ;;  %s178_s8 = scalar_lea.sflag (!%p844_p9), [#allocation3], %s909_s3 }
  0x5f   : > { %s181_s25 = scalar_lea.vmem (!%p844_p9), [#allocation2], %s366_s7  ;;  %p1020_p12 = scmp.ne.s32.totalorder (!%p844_p9), %s1008_s28, 0 }
  0x64   : > { %616 = dma.done.wait (%p1020_p12), %s178_s8, 256  }
  0x65   : > { %618 = vsyncadd (%p1020_p12), %s178_s8, 4294967040  ;;  %s186_s6 = sand.u32 1, %s633_s10   ;;  %p1021_p9 = scmp.ne.s32.totalorder %s1017_s20, 0 }
  0x66   : > { %s367_s9 = sshll.u32 %s186_s6, 4  ;;  %s187_s24 = scalar_lea.sflag [#allocation6], %s186_s6 }
  0x67   : > { %s190_s30 = scalar_lea.vmem [#allocation5], %s367_s9 }
  0x68   : > { %620 = dma.done.wait (%p1021_p9), %s187_s24, 256  }
  0x69   : > { %622 = vsyncadd (%p1021_p9), %s187_s24, 4294967040  ;;  %s370_s21 = sshll.u32 %s657_s16, 4  ;;  %s371_s23 = sshll.u32 %s653_s15, 5  ;;  %v219_v0 = vld [vmem:[%s181_s25] sm:$0xff]  ;;  %v220_v2 = vld [vmem:[%s181_s25 + $0x8] sm:$0xff] }
  0x6a   : > { %s240_s26 = sadd.s32 %s371_s23, %s370_s21  ;;  %s215_s2 = scalar_lea.vmem [#allocation7], %s366_s7  ;;  %v221_v1 = vld [vmem:[%s190_s30] sm:$0xff]  ;;  %v222_v4 = vld [vmem:[%s190_s30 + $0x8] sm:$0xff] }
  0x6b   : > { %s244_s28 = sshll.u32 %s215_s2, 4  ;;  %s372_s27 = sshll.u32 %s240_s26, 4  ;;  %v223_v3 = vadd.f32 %v221_v1, %v219_v0  ;;  %v224_v5 = vadd.f32 %v222_v4, %v220_v2  ;;  %s924_s28 = int_to_ptr.vmem [resolvable:$true] %s244_s28 }
  0x6c   : > { %s1022_s12 = sld [smem:[#allocation14_spill]]  ;;  %s228_s7 = scalar_lea.sflag [#allocation4], %s909_s3 }
  0x6d   : > { %225 = vst [vmem:[%s215_s2] sm:$0xff] %v223_v3  ;;  %226 = vst [vmem:[%s215_s2 + $0x8] sm:$0xff] %v224_v5  ;;  %s543_s6 = scalar_lea.vmem %s924_s28, 256  ;;  %p1024_p3 = scmp.ne.s32.totalorder %s1009_s29, 0 }
  0x6e   : > { %p544_p0 = scmp.ne.s32.totalorder %s924_s28, %s543_s6  ;;  %s673_s25 = smov [#allocation7]  }
  0x6f   : > { %s547_s9 = sshll.u32 %s673_s25, 4  ;;  %s548_s9 = int_to_ptr.vmem [resolvable:$false] %s547_s9 }
  0x70   : > { %p545_p2 = pnand %p544_p0, %p1024_p3  ;;  %s549_s24 = scalar_lea.vmem %s548_s9, 512 }
  0x71   : > { %p550_p10 = scmp.lt.s32.totalorder %s924_s28, %s548_s9  ;;  %p551_p7 = scmp.lt.s32.totalorder %s549_s24, %s543_s6 }
  0x72   : > { %s1023_s8 = smov %s1022_s12  ;;  %s929_s15 = scalar_lea.hbm %s1022_s12, %s372_s27 }
  0x73   : > { %p546_p5 = pneg %p545_p2  ;;  %p552_p1 = por %p551_p7, %p550_p10 }
  0x75   : > { %p553_p6 = pnand %p552_p1, %p546_p5 }
  0x77   : > { %556 = shalt.err (!%p553_p6)
}
  0x78   : > { %s557_s3 = scalar_lea.hbm %s929_s15, 256  ;;  %s561_s23 = scalar_lea.hbm %s1023_s8, 2048 }
  0x79   : > { %p558_p11 = scmp.ne.s32.totalorder %s929_s15, %s557_s3  ;;  %p562_p4 = scmp.lt.u32.totalorder %s929_s15, %s1023_s8 }
  0x7a   : > { %p563_p12 = scmp.lt.u32.totalorder %s561_s23, %s557_s3  ;;  %p565_p0 = scmp.lt.u32.totalorder %s557_s3, %s929_s15 }
  0x7b   : > { %p559_p8 = pnand %p558_p11, %p1024_p3 }
  0x7c   : > { %p564_p9 = por %p563_p12, %p562_p4 }
  0x7d   : > { %p560_p13 = pneg %p559_p8 }
  0x7e   : > { %p566_p2 = por %p565_p0, %p564_p9 }
  0x80   : > { %p567_p5 = pnand %p566_p2, %p560_p13 }
  0x82   : > { %570 = shalt.err (!%p567_p5)
}
  0x83   : > { %380 = dma.vmem_to_hbm [thread:$0]  (%p1024_p3), %s924_s28, 256, %s929_s15, %s228_s7  }
  0x84 PF: > { %s1025_s27 = sld [smem:[#allocation11_spill]]  ;;  %p394_p10 = scmp.ge.s32.totalorder %s669_s19, 2 }
  0x85   : > { %p1026_p7 = scmp.ne.s32.totalorder %s1010_s4, 0 }
  0x87   : > { %p390_p1 = pnand %p394_p10, %p1026_p7 }
  0x8a   : > { %s256_s20 = sand.u32 1, %s1025_s27  }
  0x8b   : > { %s257_s16 = scalar_lea.sflag [#allocation4], %s256_s20 }
  0x8c   : > { %624 = dma.done.wait (!%p390_p1), %s257_s16, 256  }
  0x8d   : > { %626 = vsyncadd (!%p390_p1), %s257_s16, 4294967040  ;;  %s21_s19 = sadd.s32 1, %s669_s19   ;;  %s1027_s29 = sld [smem:[#allocation12_spill]] }
  0x8e   : > { %p18_p6 = scmp.ge.s32.totalorder %s21_s19, 10   ;;  %s1028_s28 = sld [smem:[#allocation13_spill]] }
  0x8f   : > { %s1029_s9 = smov %s633_s10  ;;  %s1030_s10 = smov %s637_s11 }
  0x90   : > { %s1031_s11 = smov %s854_s22  ;;  %s1032_s12 = smov %s645_s13 }
  0x91   : > { %s1033_s13 = smov %s649_s14  ;;  %s1034_s14 = smov %s793_s5 }
  0x92   : > { %s1035_s15 = smov %s661_s17  ;;  %s1036_s16 = smov %s665_s18 }
  0x93   : > { %s1037_s17 = smov %s1027_s29  ;;  %20 = sbr.rel (!%p18_p6) target bundleno = 13 (0xd), region = 86 }
  0x94   : > { %s1038_s18 = smov %s1028_s28 }
  0x9a   :  { %262 = vsyncpa [#allocation3], 1 }
  0x9b   :  { %264 = vsyncpa [#allocation3 + $0x1], 1 }
  0x9c   :  { %265 = vsyncpa [#allocation6], 1 }
  0x9d   :  { %267 = vsyncpa [#allocation6 + $0x1], 1 }
  0x9e   :  { %268 = vsyncpa [#allocation4], 1 }
  0x9f   :  { %270 = vsyncpa [#allocation4 + $0x1], 1 }

</bundles_post_ra>
